<compile_context>
chip_gen: v6e
topology: v6e:2x2x1
jax: 0.10.0
libtpu: 0.0.40
codegen_flags: <defaults>
</compile_context>

<pallas_src>
import functools
import math

import jax
import jax.numpy as jnp
from jax.experimental import pallas as pl
from jax.experimental.pallas import tpu as pltpu


def _self_attn_kernel(x_ref, wqkv_ref, bqkv_ref, wo_ref, bo_ref, o_ref,
                      *, n_heads, d_head, causal, fast):
    """One grid step: full attention for a block of `bb` batch elements.

    x_ref    : (bb, S, D)        input tile
    wqkv_ref : (3, H, D, dh)     [q|k|v] in_proj weights, head-split; q pre-scaled
    bqkv_ref : (3, H, 1, dh)     [q|k|v] in_proj biases (f32); q pre-scaled
    wo_ref   : (H, dh, D)        out_proj weight, head-split (W_out^T)
    bo_ref   : (1, D)            out_proj bias (f32)
    o_ref    : (bb, S, D)        output tile
    """
    bb, S, D = x_ref.shape
    H, dh = n_heads, d_head
    n = bb * S                                     # tokens in this block
    f32 = jnp.float32

    # MXU operand dtype: bf16 on the fast path (MXU is bf16-native on
    # v5e/v6e/v7x); accumulation is always f32 via preferred_element_type.
    in_dtype = x_ref.dtype
    op_dtype = jnp.bfloat16 if (fast or in_dtype == jnp.bfloat16) else in_dtype
    cast = lambda a: a.astype(op_dtype)

    # ---- head-batched q/k/v projections -------------------------------------
    # (bb,S,D) -> (bb*S, D) is a layout-trivial reshape (S is a sublane tile);
    # broadcasting along the new leading head dim is cheap (untiled dim only).
    x2d = cast(x_ref[...].reshape(n, D))
    xb = jnp.broadcast_to(x2d[None], (H, n, D))    # (H, n, D)

    def proj(i):
        w = cast(wqkv_ref[i])                      # (H, D, dh)
        b = bqkv_ref[i]                            # (H, 1, dh) f32
        return jnp.einsum('hnd,hdf->hnf', xb, w,
                          preferred_element_type=f32) + b

    q = proj(0)                                    # (H, n, dh) f32, scale folded in
    k = proj(1)
    v = proj(2)

    # (H, bb*S, dh) -> (H*bb, S, dh): splits the sublane dim at a tile boundary
    # and merges into the untiled leading dim (no lane/sublane shuffles; a
    # no-op when bb == 1, which is the case for small B).
    q3 = q.reshape(H * bb, S, dh)
    k3 = k.reshape(H * bb, S, dh)
    v3 = cast(v.reshape(H * bb, S, dh))

    # ---- scaled-dot-product attention, batched over (head, batch) -----------
    s = jnp.einsum('bqd,bkd->bqk', cast(q3), cast(k3),
                   preferred_element_type=f32)     # (H*bb, S, S) f32

    if causal:
        row = jax.lax.broadcasted_iota(jnp.int32, (S, S), 0)
        col = jax.lax.broadcasted_iota(jnp.int32, (S, S), 1)
        # Additive -inf mask; -inf is invariant under the q-scaling, so this
        # matches PyTorch's mask-before-scale semantics exactly.
        s = s + jnp.where(col > row, -jnp.inf, 0.0)[None, :, :]

    # numerically-stable softmax, kept in f32 on all generations
    s = s - jnp.max(s, axis=-1, keepdims=True)
    p = jnp.exp(s)
    p = p * pl.reciprocal(jnp.sum(p, axis=-1, keepdims=True), approx=fast)

    o3 = jnp.einsum('bqk,bkd->bqd', cast(p), v3,
                    preferred_element_type=f32)    # (H*bb, S, dh)

    # ---- fold heads back through the out-projection --------------------------
    # One batched (H, n, dh) @ (H, dh, D) dot + a cheap leading-dim sum replaces
    # the head concatenate / lane-scatter and the per-head accumulate dots.
    oh = cast(o3.reshape(H, n, dh))
    yh = jnp.einsum('hnf,hfd->hnd', oh, cast(wo_ref[...]),
                    preferred_element_type=f32)    # (H, n, D) f32
    y = jnp.sum(yh, axis=0) + bo_ref[...]          # (n, D) f32

    o_ref[...] = y.reshape(bb, S, D).astype(o_ref.dtype)


def prepare_params(w_in, b_in, w_out, b_out, n_heads, weight_dtype=None):
    """One-time host-side weight layout prep (hoisted out of the per-call path).

    w_in : (3D, D)  -> wqkv (3, H, D, dh)  head-split W^T, q block pre-scaled
    b_in : (3D,)    -> bqkv (3, H, 1, dh)  f32, q block pre-scaled
    w_out: (D, D)   -> wo   (H, dh, D)     head-split W_out^T
    b_out: (D,)     -> bo   (1, D)         f32
    Biases are always kept in f32 (added to f32 accumulators in-kernel).
    """
    D = w_out.shape[0]
    dh = D // n_heads
    scale = 1.0 / math.sqrt(dh)

    w_in = jnp.asarray(w_in, jnp.float32)
    b_in = jnp.asarray(b_in, jnp.float32)
    w_out = jnp.asarray(w_out, jnp.float32)
    b_out = jnp.asarray(b_out, jnp.float32)

    wi_t = w_in.T                                           # (D, 3D) cols = [q|k|v]

    def head_split_w(m):                                    # (D, D) -> (H, D, dh)
        return m.reshape(D, n_heads, dh).transpose(1, 0, 2)

    def head_split_b(b):                                    # (D,) -> (H, 1, dh)
        return b.reshape(n_heads, 1, dh)

    wqkv = jnp.stack([head_split_w(wi_t[:, 0:D]) * scale,   # fold 1/sqrt(dh) into q
                      head_split_w(wi_t[:, D:2 * D]),
                      head_split_w(wi_t[:, 2 * D:3 * D])], axis=0)   # (3, H, D, dh)
    bqkv = jnp.stack([head_split_b(b_in[0:D]) * scale,
                      head_split_b(b_in[D:2 * D]),
                      head_split_b(b_in[2 * D:3 * D])], axis=0)      # (3, H, 1, dh) f32

    wo = w_out.T.reshape(n_heads, dh, D)                    # (H, dh, D)
    bo = b_out.reshape(1, D)                                # (1, D) f32

    if weight_dtype is not None:
        wqkv = wqkv.astype(weight_dtype)
        wo = wo.astype(weight_dtype)
        # bqkv / bo intentionally stay f32.
    return wqkv, bqkv, wo, bo


@functools.partial(jax.jit,
                   static_argnames=("n_heads", "causal_mask", "fast_math"))
def self_attention(x, wqkv, bqkv, wo, bo, n_heads,
                   causal_mask=False, fast_math=True):
    """x: (B, S, D); weights as produced by prepare_params()."""
    B, S, D = x.shape
    assert D % n_heads == 0
    d_head = D // n_heads

    # Batch block: target ~256 fused rows per step (v6e/v7x MXU is 256-wide),
    # but keep the grid at >= 2 steps whenever B >= 2 so both of v7x's
    # TensorCores get work under dimension_semantics=("parallel",).  The extra
    # ~0.35 us/step is negligible on single-TC chips (v5e/v6e), and the
    # constant-index weight blocks are not re-DMA'd across steps.
    bb = max(1, min(B, max(1, 256 // S)))
    if B >= 2:
        bb = min(bb, max(1, B // 2))
    while B % bb:
        bb -= 1

    kernel = functools.partial(_self_attn_kernel,
                               n_heads=n_heads, d_head=d_head,
                               causal=bool(causal_mask), fast=bool(fast_math))

    # Advisory cost estimate so XLA can overlap surrounding ops with this tiny,
    # latency-dominated kernel.
    flops = (2 * B * S * D * 3 * D            # qkv projection
             + 4 * B * n_heads * S * S * d_head  # scores + PV
             + 2 * B * S * D * D)             # out projection
    transcendentals = B * n_heads * S * S     # exp in softmax
    bytes_accessed = (2 * x.size * x.dtype.itemsize
                      + wqkv.size * wqkv.dtype.itemsize
                      + bqkv.size * bqkv.dtype.itemsize
                      + wo.size * wo.dtype.itemsize
                      + bo.size * bo.dtype.itemsize)

    return pl.pallas_call(
        kernel,
        out_shape=jax.ShapeDtypeStruct((B, S, D), x.dtype),
        grid=(B // bb,),
        in_specs=[
            pl.BlockSpec((bb, S, D), lambda b: (b, 0, 0)),        # x
            pl.BlockSpec(wqkv.shape, lambda b: (0, 0, 0, 0)),     # W_{q,k,v} (3,H,D,dh)
            pl.BlockSpec(bqkv.shape, lambda b: (0, 0, 0, 0)),     # b_{q,k,v} (3,H,1,dh)
            pl.BlockSpec(wo.shape, lambda b: (0, 0, 0)),          # W_out^T   (H,dh,D)
            pl.BlockSpec(bo.shape, lambda b: (0, 0)),             # b_out     (1,D)
        ],
        out_specs=pl.BlockSpec((bb, S, D), lambda b: (b, 0, 0)),
        compiler_params=pltpu.CompilerParams(
            dimension_semantics=("parallel",)),
        cost_estimate=pl.CostEstimate(flops=int(flops),
                                      transcendentals=int(transcendentals),
                                      bytes_accessed=int(bytes_accessed)),
    )(x, wqkv, bqkv, wo, bo)


def _reference(x, w_in, b_in, w_out, b_out, n_heads, causal_mask=False):
    """Pure-JAX replica of the PyTorch forward for validation."""
    B, S, D = x.shape
    d_head = D // n_heads
    qkv = x @ w_in.T + b_in
    q, k, v = jnp.split(qkv, 3, axis=-1)

    def heads(t):  # (B, S, D) -> (B, H, S, dh)
        return t.reshape(B, S, n_heads, d_head).transpose(0, 2, 1, 3)

    q, k, v = heads(q), heads(k), heads(v)
    w = jnp.einsum("bhqd,bhkd->bhqk", q, k)
    if causal_mask:
        mask = jnp.triu(jnp.ones((S, S), dtype=bool), 1)
        w = jnp.where(mask[None, None], -jnp.inf, w)
    w = w / math.sqrt(d_head)
    w = jax.nn.softmax(w, axis=-1)
    o = jnp.einsum("bhqk,bhkd->bhqd", w, v)
    o = o.transpose(0, 2, 1, 3).reshape(B, S, D)
    return o @ w_out.T + b_out


if __name__ == "__main__":
    # Small shapes consistent with the module: batch=2, seq=8, d_embed=32, heads=4.
    B, S, D, H = 2, 8, 32, 4

    key = jax.random.PRNGKey(0)
    kx, kwi, kbi, kwo, kbo = jax.random.split(key, 5)

    bound = 1.0 / math.sqrt(D)
    w_in = jax.random.uniform(kwi, (3 * D, D), jnp.float32, -bound, bound)
    b_in = jax.random.uniform(kbi, (3 * D,), jnp.float32, -bound, bound)
    w_out = jax.random.uniform(kwo, (D, D), jnp.float32, -bound, bound)
    b_out = jax.random.uniform(kbo, (D,), jnp.float32, -bound, bound)
    x = jax.random.normal(kx, (B, S, D), jnp.float32)

    params = prepare_params(w_in, b_in, w_out, b_out, H)   # one-time layout prep

    ref = _reference(x, w_in, b_in, w_out, b_out, H, causal_mask=False)
    ref_c = _reference(x, w_in, b_in, w_out, b_out, H, causal_mask=True)

    # ---- exact f32 path (fast_math=False), non-causal ------------------------
    out = jax.block_until_ready(
        self_attention(x, *params, n_heads=H, causal_mask=False,
                       fast_math=False))
    assert out.shape == (B, S, D)
    assert jnp.allclose(out, ref, atol=1e-4, rtol=1e-4), "mismatch vs reference"

    # ---- exact f32 path, causal ----------------------------------------------
    out_c = jax.block_until_ready(
        self_attention(x, *params, n_heads=H, causal_mask=True,
                       fast_math=False))
    assert jnp.allclose(out_c, ref_c, atol=1e-4, rtol=1e-4), \
        "mismatch vs reference (causal)"

    # ---- fast path on f32 inputs: bf16 MXU operands + approx reciprocal ------
    out_f = jax.block_until_ready(
        self_attention(x, *params, n_heads=H, causal_mask=False,
                       fast_math=True))
    assert jnp.allclose(out_f, ref, atol=3e-2, rtol=3e-2), \
        "mismatch vs reference (fast_math)"

    # ---- native bf16 activations/weights (biases stay f32) -------------------
    x_bf = x.astype(jnp.bfloat16)
    params_bf = prepare_params(w_in, b_in, w_out, b_out, H,
                               weight_dtype=jnp.bfloat16)
    out_bf = jax.block_until_ready(
        self_attention(x_bf, *params_bf, n_heads=H, causal_mask=False,
                       fast_math=True))
    assert out_bf.shape == (B, S, D)
    assert jnp.allclose(out_bf.astype(jnp.float32), ref, atol=1e-1, rtol=1e-1), \
        "mismatch vs reference (bf16)"

    print("KERNEL_OK")
</pallas_src>

<mosaic_0001>
module attributes {stable_mosaic.version = 11 : i64} {
  func.func @_self_attn_kernel(%arg0: i32, %arg1: memref<1x8x32xf32, #tpu.memory_space<vmem>>, %arg2: memref<3x4x32x8xf32, #tpu.memory_space<vmem>>, %arg3: memref<3x4x1x8xf32, #tpu.memory_space<vmem>>, %arg4: memref<4x8x32xf32, #tpu.memory_space<vmem>>, %arg5: memref<1x32xf32, #tpu.memory_space<vmem>>, %arg6: memref<1x8x32xf32, #tpu.memory_space<vmem>>) attributes {dimension_semantics = [#tpu.dimension_semantics<parallel>], iteration_bounds = array<i64: 2>, scalar_prefetch = 0 : i64, scratch_operands = 0 : i64, tpu.core_type = #tpu.core_type<tc>, window_params = [{transform_indices = @transform_0, window_bounds = array<i64: 1, 8, 32>}, {pipeline_mode = #tpu.pipeline_mode<synchronous>, transform_indices = @transform_1, window_bounds = array<i64: 3, 4, 32, 8>}, {pipeline_mode = #tpu.pipeline_mode<synchronous>, transform_indices = @transform_2, window_bounds = array<i64: 3, 4, 1, 8>}, {pipeline_mode = #tpu.pipeline_mode<synchronous>, transform_indices = @transform_3, window_bounds = array<i64: 4, 8, 32>}, {pipeline_mode = #tpu.pipeline_mode<synchronous>, transform_indices = @transform_4, window_bounds = array<i64: 1, 32>}, {transform_indices = @transform_5, window_bounds = array<i64: 1, 8, 32>}]} {
    %c0 = arith.constant 0 : index
    %c0_0 = arith.constant 0 : index
    %c0_1 = arith.constant 0 : index
    %0 = vector.load %arg1[%c0, %c0_0, %c0_1] : memref<1x8x32xf32, #tpu.memory_space<vmem>>, vector<1x8x32xf32>
    %1 = vector.shape_cast %0 : vector<1x8x32xf32> to vector<8x32xf32>
    %2 = vector.shape_cast %1 : vector<8x32xf32> to vector<1x8x32xf32>
    %3 = vector.shape_cast %2 : vector<1x8x32xf32> to vector<1x8x32xf32>
    %4 = vector.broadcast %3 : vector<1x8x32xf32> to vector<4x8x32xf32>
    %c0_2 = arith.constant 0 : index
    %c0_3 = arith.constant 0 : index
    %c0_4 = arith.constant 0 : index
    %c0_5 = arith.constant 0 : index
    %5 = vector.load %arg2[%c0_2, %c0_3, %c0_4, %c0_5] : memref<3x4x32x8xf32, #tpu.memory_space<vmem>>, vector<1x4x32x8xf32>
    %6 = vector.shape_cast %5 : vector<1x4x32x8xf32> to vector<4x32x8xf32>
    %c0_6 = arith.constant 0 : index
    %c0_7 = arith.constant 0 : index
    %c0_8 = arith.constant 0 : index
    %c0_9 = arith.constant 0 : index
    %7 = vector.load %arg3[%c0_6, %c0_7, %c0_8, %c0_9] : memref<3x4x1x8xf32, #tpu.memory_space<vmem>>, vector<1x4x1x8xf32>
    %8 = vector.shape_cast %7 : vector<1x4x1x8xf32> to vector<4x1x8xf32>
    "tpu.trace_start"() <{level = 10 : i32, message = "hnd,hdf->hnf"}> : () -> ()
    %cst = arith.constant dense<0.000000e+00> : vector<4x8x8xf32>
    %9 = tpu.matmul %4, %6, %cst {dimension_numbers = #tpu.dot_dimension_numbers<[2], [1], [1], [2], [0, 0, 0, 1, 1, 2], [0], [0]>} : vector<4x8x32xf32>, vector<4x32x8xf32>, vector<4x8x8xf32> -> vector<4x8x8xf32>
    "tpu.trace_stop"() : () -> ()
    %10 = vector.broadcast %8 : vector<4x1x8xf32> to vector<4x8x8xf32>
    %11 = arith.addf %9, %10 : vector<4x8x8xf32>
    %c1 = arith.constant 1 : index
    %c0_10 = arith.constant 0 : index
    %c0_11 = arith.constant 0 : index
    %c0_12 = arith.constant 0 : index
    %12 = vector.load %arg2[%c1, %c0_10, %c0_11, %c0_12] : memref<3x4x32x8xf32, #tpu.memory_space<vmem>>, vector<1x4x32x8xf32>
    %13 = vector.shape_cast %12 : vector<1x4x32x8xf32> to vector<4x32x8xf32>
    %c1_13 = arith.constant 1 : index
    %c0_14 = arith.constant 0 : index
    %c0_15 = arith.constant 0 : index
    %c0_16 = arith.constant 0 : index
    %14 = vector.load %arg3[%c1_13, %c0_14, %c0_15, %c0_16] : memref<3x4x1x8xf32, #tpu.memory_space<vmem>>, vector<1x4x1x8xf32>
    %15 = vector.shape_cast %14 : vector<1x4x1x8xf32> to vector<4x1x8xf32>
    "tpu.trace_start"() <{level = 10 : i32, message = "hnd,hdf->hnf"}> : () -> ()
    %cst_17 = arith.constant dense<0.000000e+00> : vector<4x8x8xf32>
    %16 = tpu.matmul %4, %13, %cst_17 {dimension_numbers = #tpu.dot_dimension_numbers<[2], [1], [1], [2], [0, 0, 0, 1, 1, 2], [0], [0]>} : vector<4x8x32xf32>, vector<4x32x8xf32>, vector<4x8x8xf32> -> vector<4x8x8xf32>
    "tpu.trace_stop"() : () -> ()
    %17 = vector.broadcast %15 : vector<4x1x8xf32> to vector<4x8x8xf32>
    %18 = arith.addf %16, %17 : vector<4x8x8xf32>
    %c2 = arith.constant 2 : index
    %c0_18 = arith.constant 0 : index
    %c0_19 = arith.constant 0 : index
    %c0_20 = arith.constant 0 : index
    %19 = vector.load %arg2[%c2, %c0_18, %c0_19, %c0_20] : memref<3x4x32x8xf32, #tpu.memory_space<vmem>>, vector<1x4x32x8xf32>
    %20 = vector.shape_cast %19 : vector<1x4x32x8xf32> to vector<4x32x8xf32>
    %c2_21 = arith.constant 2 : index
    %c0_22 = arith.constant 0 : index
    %c0_23 = arith.constant 0 : index
    %c0_24 = arith.constant 0 : index
    %21 = vector.load %arg3[%c2_21, %c0_22, %c0_23, %c0_24] : memref<3x4x1x8xf32, #tpu.memory_space<vmem>>, vector<1x4x1x8xf32>
    %22 = vector.shape_cast %21 : vector<1x4x1x8xf32> to vector<4x1x8xf32>
    "tpu.trace_start"() <{level = 10 : i32, message = "hnd,hdf->hnf"}> : () -> ()
    %cst_25 = arith.constant dense<0.000000e+00> : vector<4x8x8xf32>
    %23 = tpu.matmul %4, %20, %cst_25 {dimension_numbers = #tpu.dot_dimension_numbers<[2], [1], [1], [2], [0, 0, 0, 1, 1, 2], [0], [0]>} : vector<4x8x32xf32>, vector<4x32x8xf32>, vector<4x8x8xf32> -> vector<4x8x8xf32>
    "tpu.trace_stop"() : () -> ()
    %24 = vector.broadcast %22 : vector<4x1x8xf32> to vector<4x8x8xf32>
    %25 = arith.addf %23, %24 : vector<4x8x8xf32>
    "tpu.trace_start"() <{level = 10 : i32, message = "bqd,bkd->bqk"}> : () -> ()
    %cst_26 = arith.constant dense<0.000000e+00> : vector<4x8x8xf32>
    %26 = tpu.matmul %11, %18, %cst_26 {dimension_numbers = #tpu.dot_dimension_numbers<[2], [2], [1], [1], [0, 0, 0, 1, 1, 1], [0], [0]>} : vector<4x8x8xf32>, vector<4x8x8xf32>, vector<4x8x8xf32> -> vector<4x8x8xf32>
    "tpu.trace_stop"() : () -> ()
    %cst_27 = arith.constant dense<0xFF800000> : vector<4x8xf32>
    %27 = vector.multi_reduction <maximumf>, %26, %cst_27 [2] : vector<4x8x8xf32> to vector<4x8xf32>
    %28 = vector.shape_cast %27 : vector<4x8xf32> to vector<4x8x1xf32>
    %29 = vector.broadcast %28 : vector<4x8x1xf32> to vector<4x8x8xf32>
    %30 = arith.subf %26, %29 : vector<4x8x8xf32>
    %31 = math.exp %30 : vector<4x8x8xf32>
    %cst_28 = arith.constant dense<0.000000e+00> : vector<4x8xf32>
    %32 = vector.multi_reduction <add>, %31, %cst_28 [2] : vector<4x8x8xf32> to vector<4x8xf32>
    %33 = vector.shape_cast %32 : vector<4x8xf32> to vector<4x8x1xf32>
    %34 = tpu.reciprocal %33 : vector<4x8x1xf32> -> vector<4x8x1xf32>
    %35 = vector.broadcast %34 : vector<4x8x1xf32> to vector<4x8x8xf32>
    %36 = arith.mulf %31, %35 : vector<4x8x8xf32>
    "tpu.trace_start"() <{level = 10 : i32, message = "bqk,bkd->bqd"}> : () -> ()
    %cst_29 = arith.constant dense<0.000000e+00> : vector<4x8x8xf32>
    %37 = tpu.matmul %36, %25, %cst_29 {dimension_numbers = #tpu.dot_dimension_numbers<[2], [1], [1], [2], [0, 0, 0, 1, 1, 2], [0], [0]>} : vector<4x8x8xf32>, vector<4x8x8xf32>, vector<4x8x8xf32> -> vector<4x8x8xf32>
    "tpu.trace_stop"() : () -> ()
    %c0_30 = arith.constant 0 : index
    %c0_31 = arith.constant 0 : index
    %c0_32 = arith.constant 0 : index
    %38 = vector.load %arg4[%c0_30, %c0_31, %c0_32] : memref<4x8x32xf32, #tpu.memory_space<vmem>>, vector<4x8x32xf32>
    "tpu.trace_start"() <{level = 10 : i32, message = "hnf,hfd->hnd"}> : () -> ()
    %cst_33 = arith.constant dense<0.000000e+00> : vector<4x8x32xf32>
    %39 = tpu.matmul %37, %38, %cst_33 {dimension_numbers = #tpu.dot_dimension_numbers<[2], [1], [1], [2], [0, 0, 0, 1, 1, 2], [0], [0]>} : vector<4x8x8xf32>, vector<4x8x32xf32>, vector<4x8x32xf32> -> vector<4x8x32xf32>
    "tpu.trace_stop"() : () -> ()
    %cst_34 = arith.constant dense<0.000000e+00> : vector<8x32xf32>
    %40 = vector.multi_reduction <add>, %39, %cst_34 [0] : vector<4x8x32xf32> to vector<8x32xf32>
    %c0_35 = arith.constant 0 : index
    %c0_36 = arith.constant 0 : index
    %41 = vector.load %arg5[%c0_35, %c0_36] : memref<1x32xf32, #tpu.memory_space<vmem>>, vector<1x32xf32>
    %42 = vector.broadcast %41 : vector<1x32xf32> to vector<8x32xf32>
    %43 = arith.addf %40, %42 : vector<8x32xf32>
    %44 = vector.shape_cast %43 : vector<8x32xf32> to vector<1x8x32xf32>
    %c0_37 = arith.constant 0 : index
    %c0_38 = arith.constant 0 : index
    %c0_39 = arith.constant 0 : index
    %45 = vector.load %arg6[%c0_37, %c0_38, %c0_39] : memref<1x8x32xf32, #tpu.memory_space<vmem>>, vector<1x8x32xf32>
    tpu.vector_store %arg6[%c0_37, %c0_38, %c0_39], %44 {strides = array<i32>} : memref<1x8x32xf32, #tpu.memory_space<vmem>>, vector<1x8x32xf32>,
    return
  }
  func.func @transform_0(%arg0: i32) -> (i32, i32, i32) {
    %c0_i32 = arith.constant 0 : i32
    %c0_i32_0 = arith.constant 0 : i32
    %c0_i32_1 = arith.constant 0 : i32
    return %arg0, %c0_i32, %c0_i32_0 : i32, i32, i32
  }
  func.func @transform_1(%arg0: i32) -> (i32, i32, i32, i32) {
    %c0_i32 = arith.constant 0 : i32
    %c0_i32_0 = arith.constant 0 : i32
    %c0_i32_1 = arith.constant 0 : i32
    %c0_i32_2 = arith.constant 0 : i32
    %c0_i32_3 = arith.constant 0 : i32
    return %c0_i32, %c0_i32_0, %c0_i32_1, %c0_i32_2 : i32, i32, i32, i32
  }
  func.func @transform_2(%arg0: i32) -> (i32, i32, i32, i32) {
    %c0_i32 = arith.constant 0 : i32
    %c0_i32_0 = arith.constant 0 : i32
    %c0_i32_1 = arith.constant 0 : i32
    %c0_i32_2 = arith.constant 0 : i32
    %c0_i32_3 = arith.constant 0 : i32
    return %c0_i32, %c0_i32_0, %c0_i32_1, %c0_i32_2 : i32, i32, i32, i32
  }
  func.func @transform_3(%arg0: i32) -> (i32, i32, i32) {
    %c0_i32 = arith.constant 0 : i32
    %c0_i32_0 = arith.constant 0 : i32
    %c0_i32_1 = arith.constant 0 : i32
    %c0_i32_2 = arith.constant 0 : i32
    return %c0_i32, %c0_i32_0, %c0_i32_1 : i32, i32, i32
  }
  func.func @transform_4(%arg0: i32) -> (i32, i32) {
    %c0_i32 = arith.constant 0 : i32
    %c0_i32_0 = arith.constant 0 : i32
    %c0_i32_1 = arith.constant 0 : i32
    return %c0_i32, %c0_i32_0 : i32, i32
  }
  func.func @transform_5(%arg0: i32) -> (i32, i32, i32) {
    %c0_i32 = arith.constant 0 : i32
    %c0_i32_0 = arith.constant 0 : i32
    %c0_i32_1 = arith.constant 0 : i32
    return %arg0, %c0_i32, %c0_i32_0 : i32, i32, i32
  }
}

</mosaic_0001>

<bundles_post_ra>
// kernel: self_attention.1
= control target key start
LH: loop header
LB: loop body
LE: loop exit
PB: predicated region body
PF: predicated region fallthrough
CT: control target
= control target key end

     0   :  { %10 = vsyncpa [#allocation3], 0  ;;  %s3194_s0 = inlined_call_operand.vmem [shape: f32[2,8,32], index: 0, kind: input, shape index: {}]   ;;  %s3195_s1 = inlined_call_operand.vmem [shape: f32[3,4,32,8], index: 1, kind: input, shape index: {}]   ;;  %s3196_s2 = inlined_call_operand.vmem [shape: f32[3,4,1,8], index: 2, kind: input, shape index: {}]   ;;  %s3197_s3 = inlined_call_operand.vmem [shape: f32[4,8,32], index: 3, kind: input, shape index: {}]   ;;  %s3198_s4 = inlined_call_operand.vmem [shape: f32[1,32], index: 4, kind: input, shape index: {}]   ;;  %s3199_s5 = inlined_call_operand.hbm [shape: f32[2,8,32], index: 5, kind: output, shape index: {}]  }
   0x1   :  { %12 = vsyncpa [#allocation3 + $0x1], 0  ;;  %s2746_s18 = smov 0   ;;  %s2748_s19 = smov 0  }
   0x2   :  { %s2750_s20 = smov 0   ;;  %s2752_s21 = smov 0  }
   0x3 LB: > { %s2767_s22 = sadd.s32 4294967295, %s2711_s21   ;;  %s2227_s23 = sadd.s32 4294967294, %s2711_s21   ;;  %s2711_s21 = sphi %s2752_s21, %s3205_s21   ;;  %s2707_s20 = sphi %s2750_s20, %s3204_s20   ;;  %s2703_s19 = sphi %s2748_s19, %s3203_s19   ;;  %s2699_s18 = sphi %s2746_s18, %s3202_s18  }
   0x4   : > { %s2771_s24 = sadd.s32 1, %s2711_s21   ;;  %s135_s25 = sadd.s32 1, %s2707_s20 }
   0x5   : > { %s132_s26 = ssub.s32 %s2711_s21, %s2771_s24  ;;  %p145_p0 = scmp.ne.s32.totalorder %s2707_s20, %s2703_s19 }
   0x6   : > { %p133_p1 = scmp.eq.s32.totalorder %s132_s26, 0  ;;  %p146_p2 = scmp.eq.s32.totalorder %s2767_s22, 1 }
   0x7   : > { %p151_p3 = scmp.ne.s32.totalorder %s2703_s19, %s2699_s18  ;;  %p152_p4 = scmp.eq.s32.totalorder %s2227_s23, 1 }
   0x8   : > { %s2782_s27 = scalar_select %p133_p1, %s2707_s20, %s135_s25  }
   0x9   : > { %p2784_p5 = por %p146_p2, %p145_p0  ;;  %p2788_p6 = por %p152_p4, %p151_p3 }
   0xa   : > { %p2230_p7 = scmp.ge.s32.totalorder %s2711_s21, 1  ;;  %p189_p8 = scmp.lt.s32.totalorder %s2711_s21, 3 }
   0xc   : > { %p190_p9 = pnand %p2230_p7, %p189_p8 }
   0xd   : > { %p216_p10 = scmp.lt.s32.totalorder (!%p190_p9), %s2767_s22, 1  ;;  %s213_s10 = sand.u32 (!%p190_p9), 1, %s2703_s19  }
   0xe   : > { %193 = sbr.rel (%p190_p9) target bundleno = 1170 (0x492), region = 40  ;;  %s2231_s11 = sshll.u32 (!%p190_p9), %s213_s10, 3 }
   0xf   : > { %s2315_s14 = sshll.u32 (!%p190_p9), %s2767_s22, 7  ;;  %s215_s15 = scalar_lea.vmem (!%p190_p9), [#allocation2], %s2231_s11 }
  0x10   : > { %s2168_s16 = sshll.u32 (!%p190_p9), %s215_s15, 4  ;;  %s2166_s25 = scalar_lea.hbm (!%p190_p9), %s3199_s5, %s2315_s14  ;;  %s2169_s16 = int_to_ptr.vmem [resolvable:$true] %s2168_s16 }
  0x11   : > { %s2155_s26 = scalar_lea.sflag (!%p190_p9), [#allocation3], %s213_s10  ;;  %s2651_s30 = scalar_lea.vmem (!%p190_p9), %s2169_s16, 128 }
  0x12   : > { %p2652_p11 = scmp.ne.s32.totalorder (!%p190_p9), %s2169_s16, %s2651_s30  ;;  %s2715_s6 = smov (!%p190_p9), [#allocation2]  }
  0x13   : > { %v224_v0 = vld [vmem:[%s3195_s1 + $0x18] sm:$0xff]  ;;  %v2713_v2 = vmov 0.0   ;;  %v223_v3 = vld [vmem:[%s3195_s1 + $0x10] sm:$0xff]  ;;  %s217_s13 = scalar_select %p216_p10, %s2767_s22, 1  ;;  %v222_v5 = vld [vmem:[%s3195_s1 + $0x8] sm:$0xff]  ;;  %vm265_vm0 = vcmask 261120  }
  0x14   : > { %v228_v1 = vld [vmem:[%s3195_s1 + $0x38] sm:$0xff]  ;;  %2402 = vmatprep.subr.mxu0 %v2713_v2  ;;  %2413 = vmatprep.subr.mxu1 %v2713_v2  ;;  %v227_v4 = vld [vmem:[%s3195_s1 + $0x30] sm:$0xff]  ;;  %v226_v6 = vld [vmem:[%s3195_s1 + $0x28] sm:$0xff]  ;;  %vm2714_vm1 = vmmov 0   ;;  %vm1201_vm2 = vcmask 64512   ;;  %p2653_p12 = pnand %p2652_p11, %p2784_p5  ;;  %s2655_s22 = sshll.u32 %s2715_s6, 4  ;;  %s2656_s22 = int_to_ptr.vmem [resolvable:$false] %s2655_s22 }
  0x15   : > { %2403 = vmatpush3.msra.mxu0 %v224_v0  ;;  %2414 = vmatpush3.msra.mxu1 %v228_v1  ;;  %s2232_s23 = sshll.u32 %s217_s13, 3  ;;  %v221_v7 = vld [vmem:[%s3195_s1] sm:$0xff]  ;;  %v232_v10 = vld [vmem:[%s3195_s1 + $0x58] sm:$0xff]  ;;  %v231_v12 = vld [vmem:[%s3195_s1 + $0x50] sm:$0xff]  ;;  %p2658_p0 = scmp.lt.s32.totalorder %s2169_s16, %s2656_s22 }
  0x16   : > { %2404 = vmatprep.subr.mxu0 %v2713_v2  ;;  %2415 = vmatprep.subr.mxu1 %v2713_v2  ;;  %s219_s7 = scalar_lea.vmem %s3194_s0, %s2232_s23  ;;  %v225_v8 = vld [vmem:[%s3195_s1 + $0x20] sm:$0xff]  ;;  %v236_v11 = vld [vmem:[%s3195_s1 + $0x78] sm:$0xff]  ;;  %v235_v13 = vld [vmem:[%s3195_s1 + $0x70] sm:$0xff]  ;;  %p2654_p13 = pneg %p2653_p12 }
  0x17   : > { %2405 = vmatpush3.msra.mxu0 %v223_v3  ;;  %2416 = vmatpush3.msra.mxu1 %v227_v4  ;;  %v2829_v9 = vld [vmem:[%s219_s7] sm:$0xff]  ;;  %v230_v14 = vld [vmem:[%s3195_s1 + $0x48] sm:$0xff]  ;;  %v2244_v18 = vld [vmem:[%s3195_s1 + $0x98] sm:$0xff]  ;;  %s2657_s7 = scalar_lea.vmem %s2656_s22, 256 }
  0x18   : > { %2406 = vmatprep.subr.mxu0 %v2713_v2  ;;  %2417 = vmatprep.subr.mxu1 %v2713_v2  ;;  %v234_v15 = vld [vmem:[%s3195_s1 + $0x68] sm:$0xff]  ;;  %v229_v16 = vld [vmem:[%s3195_s1 + $0x40] sm:$0xff]  ;;  %v2248_v19 = vld [vmem:[%s3195_s1 + $0xb8] sm:$0xff]  ;;  %p2659_p1 = scmp.lt.s32.totalorder %s2657_s7, %s2651_s30 }
  0x19   : > { %2407 = vmatpush3.msra.mxu0 %v222_v5  ;;  %2418 = vmatpush3.msra.mxu1 %v226_v6  ;;  %v233_v17 = vld [vmem:[%s3195_s1 + $0x60] sm:$0xff]  ;;  %v2243_v20 = vld [vmem:[%s3195_s1 + $0x90] sm:$0xff]  ;;  %v2242_v22 = vld [vmem:[%s3195_s1 + $0x88] sm:$0xff] }
  0x1a   : > { %2408 = vmatprep.subr.mxu0 %v2713_v2  ;;  %2419 = vmatprep.subr.mxu1 %v2713_v2  ;;  %v2247_v21 = vld [vmem:[%s3195_s1 + $0xb0] sm:$0xff]  ;;  %v2246_v23 = vld [vmem:[%s3195_s1 + $0xa8] sm:$0xff]  ;;  %v2241_v24 = vld [vmem:[%s3195_s1 + $0x80] sm:$0xff]  ;;  %p2660_p2 = por %p2659_p1, %p2658_p0 }
  0x1b   : > { %2409 = vmatpush3.msra.mxu0 %v221_v7  ;;  %2410 = vmatprep.mubr.msk.f32.mxu0 %vm2714_vm1, %v2713_v2  ;;  %v2245_v25 = vld [vmem:[%s3195_s1 + $0xa0] sm:$0xff]  ;;  %v2252_v26 = vld [vmem:[%s3195_s1 + $0xd8] sm:$0xff]  ;;  %v2251_v28 = vld [vmem:[%s3195_s1 + $0xd0] sm:$0xff] }
  0x1c   : > { %2420 = vmatpush3.msra.mxu1 %v225_v8  ;;  %2411 = vmatmul.mubr.msk.f32.vlgmr.msra.gmra.mxu0 %vm265_vm0, %v2829_v9  ;;  %v2256_v27 = vld [vmem:[%s3195_s1 + $0xf8] sm:$0xff]  ;;  %v2255_v29 = vld [vmem:[%s3195_s1 + $0xf0] sm:$0xff]  ;;  %v2250_v30 = vld [vmem:[%s3195_s1 + $0xc8] sm:$0xff]  ;;  %p2661_p3 = pnand %p2660_p2, %p2654_p13 }
  0x1d   : > { %2421 = vmatprep.mubr.msk.f32.mxu1 %vm2714_vm1, %v2713_v2  ;;  %2424 = vmatprep.subr.mxu0 %v2713_v2  ;;  %v2254_v31 = vld [vmem:[%s3195_s1 + $0xe8] sm:$0xff]  ;;  %v2249_v32 = vld [vmem:[%s3195_s1 + $0xc0] sm:$0xff]  ;;  %v2272_v34 = vld [vmem:[%s3195_s1 + $0x118] sm:$0xff] }
  0x1e   : > { %2435 = vmatprep.subr.mxu1 %v2713_v2  ;;  %2422 = vmatmul.mubr.msk.f32.vlgmr.msra.gmra.mxu1 %vm265_vm0, %v2829_v9  ;;  %v2253_v33 = vld [vmem:[%s3195_s1 + $0xe0] sm:$0xff]  ;;  %v2276_v35 = vld [vmem:[%s3195_s1 + $0x138] sm:$0xff]  ;;  %v2271_v36 = vld [vmem:[%s3195_s1 + $0x110] sm:$0xff] }
  0x1f   : > { %2425 = vmatpush3.msra.mxu0 %v232_v10  ;;  %2436 = vmatpush3.msra.mxu1 %v236_v11  ;;  %v2275_v37 = vld [vmem:[%s3195_s1 + $0x130] sm:$0xff]  ;;  %v2270_v38 = vld [vmem:[%s3195_s1 + $0x108] sm:$0xff]  ;;  %v2269_v40 = vld [vmem:[%s3195_s1 + $0x100] sm:$0xff] }
  0x20   : > { %2426 = vmatprep.subr.mxu0 %v2713_v2  ;;  %2437 = vmatprep.subr.mxu1 %v2713_v2  ;;  %v2274_v39 = vld [vmem:[%s3195_s1 + $0x128] sm:$0xff]  ;;  %v2273_v41 = vld [vmem:[%s3195_s1 + $0x120] sm:$0xff]  ;;  %v2280_v42 = vld [vmem:[%s3195_s1 + $0x158] sm:$0xff] }
  0x21   : > { %2427 = vmatpush3.msra.mxu0 %v231_v12  ;;  %2438 = vmatpush3.msra.mxu1 %v235_v13  ;;  %v2284_v43 = vld [vmem:[%s3195_s1 + $0x178] sm:$0xff]  ;;  %v2279_v44 = vld [vmem:[%s3195_s1 + $0x150] sm:$0xff]  ;;  %v2278_v46 = vld [vmem:[%s3195_s1 + $0x148] sm:$0xff] }
  0x22   : > { %2428 = vmatprep.subr.mxu0 %v2713_v2  ;;  %2439 = vmatprep.subr.mxu1 %v2713_v2  ;;  %v2283_v45 = vld [vmem:[%s3195_s1 + $0x170] sm:$0xff]  ;;  %v2282_v47 = vld [vmem:[%s3195_s1 + $0x168] sm:$0xff]  ;;  %v2277_v48 = vld [vmem:[%s3195_s1 + $0x140] sm:$0xff] }
  0x23   : > { %2429 = vmatpush3.msra.mxu0 %v230_v14  ;;  %2440 = vmatpush3.msra.mxu1 %v234_v15  ;;  %v2281_v49 = vld [vmem:[%s3195_s1 + $0x160] sm:$0xff] }
  0x24   : > { %2430 = vmatprep.subr.mxu0 %v2713_v2  ;;  %2441 = vmatprep.subr.mxu1 %v2713_v2  ;;  %v2261_v58 = vld [vmem:[%s3196_s2 + $0x4] ss:$0 sm:$0xff]  ;;  %v2262_v59 = vld [vmem:[%s3196_s2 + $0x5] ss:$0 sm:$0xff]  ;;  %v2233_v62 = vld [vmem:[%s3196_s2] ss:$0 sm:$0xff] }
  0x25   : > { %2431 = vmatpush3.msra.mxu0 %v229_v16  ;;  %2432 = vmatprep.mubr.msk.f32.mxu0 %vm2714_vm1, %v2713_v2  ;;  %v2234_v63 = vld [vmem:[%s3196_s2 + $0x1] ss:$0 sm:$0xff]  ;;  %v2263_v7 = vld [vmem:[%s3196_s2 + $0x6] ss:$0 sm:$0xff]  ;;  %v2264_v8 = vld [vmem:[%s3196_s2 + $0x7] ss:$0 sm:$0xff] }
  0x26   : > { %2442 = vmatpush3.msra.mxu1 %v233_v17  ;;  %2433 = vmatmul.mubr.msk.f32.vlgmr.msra.gmra.mxu0 %vm265_vm0, %v2829_v9  ;;  %v2235_v11 = vld [vmem:[%s3196_s2 + $0x2] ss:$0 sm:$0xff]  ;;  %v2236_v12 = vld [vmem:[%s3196_s2 + $0x3] ss:$0 sm:$0xff] }
  0x27   : > { %2443 = vmatprep.mubr.msk.f32.mxu1 %vm2714_vm1, %v2713_v2  ;;  %2446 = vmatprep.subr.mxu0 %v2713_v2 }
  0x28   : > { %2457 = vmatprep.subr.mxu1 %v2713_v2  ;;  %2444 = vmatmul.mubr.msk.f32.vlgmr.msra.gmra.mxu1 %vm265_vm0, %v2829_v9 }
  0x29   : > { %2447 = vmatpush3.msra.mxu0 %v2244_v18  ;;  %2458 = vmatpush3.msra.mxu1 %v2248_v19  ;;  %v2289_v19 = vld [vmem:[%s3196_s2 + $0x8] ss:$0 sm:$0xff] }
  0x2a   : > { %2448 = vmatprep.subr.mxu0 %v2713_v2  ;;  %2459 = vmatprep.subr.mxu1 %v2713_v2 }
  0x2b   : > { %2449 = vmatpush3.msra.mxu0 %v2243_v20  ;;  %2460 = vmatpush3.msra.mxu1 %v2247_v21  ;;  %v2290_v20 = vld [vmem:[%s3196_s2 + $0x9] ss:$0 sm:$0xff] }
  0x2c   : > { %2450 = vmatprep.subr.mxu0 %v2713_v2  ;;  %2461 = vmatprep.subr.mxu1 %v2713_v2 }
  0x2d   : > { %2451 = vmatpush3.msra.mxu0 %v2242_v22  ;;  %2462 = vmatpush3.msra.mxu1 %v2246_v23 }
  0x2e   : > { %2452 = vmatprep.subr.mxu0 %v2713_v2  ;;  %2463 = vmatprep.subr.mxu1 %v2713_v2 }
  0x2f   : > { %2453 = vmatpush3.msra.mxu0 %v2241_v24  ;;  %2454 = vmatprep.mubr.msk.f32.mxu0 %vm2714_vm1, %v2713_v2 }
  0x30   : > { %2464 = vmatpush3.msra.mxu1 %v2245_v25  ;;  %2465 = vmatprep.mubr.msk.f32.mxu1 %vm2714_vm1, %v2713_v2 }
  0x31   : > { %2455 = vmatmul.mubr.msk.f32.vlgmr.msra.gmra.mxu0 %vm265_vm0, %v2829_v9  ;;  %2466 = vmatmul.mubr.msk.f32.vlgmr.msra.gmra.mxu1 %vm265_vm0, %v2829_v9 }
  0x32   : > { %2468 = vmatprep.subr.mxu0 %v2713_v2  ;;  %2479 = vmatprep.subr.mxu1 %v2713_v2 }
  0x33   : > { %2469 = vmatpush3.msra.mxu0 %v2252_v26  ;;  %2480 = vmatpush3.msra.mxu1 %v2256_v27 }
  0x34   : > { %2470 = vmatprep.subr.mxu0 %v2713_v2  ;;  %2481 = vmatprep.subr.mxu1 %v2713_v2 }
  0x35   : > { %2471 = vmatpush3.msra.mxu0 %v2251_v28  ;;  %2482 = vmatpush3.msra.mxu1 %v2255_v29 }
  0x36   : > { %2472 = vmatprep.subr.mxu0 %v2713_v2  ;;  %2483 = vmatprep.subr.mxu1 %v2713_v2 }
  0x37   : > { %2473 = vmatpush3.msra.mxu0 %v2250_v30  ;;  %2484 = vmatpush3.msra.mxu1 %v2254_v31 }
  0x38   : > { %2474 = vmatprep.subr.mxu0 %v2713_v2  ;;  %2485 = vmatprep.subr.mxu1 %v2713_v2 }
  0x39   : > { %2475 = vmatpush3.msra.mxu0 %v2249_v32  ;;  %2476 = vmatprep.mubr.msk.f32.mxu0 %vm2714_vm1, %v2713_v2 }
  0x3a   : > { %2486 = vmatpush3.msra.mxu1 %v2253_v33  ;;  %2487 = vmatprep.mubr.msk.f32.mxu1 %vm2714_vm1, %v2713_v2 }
  0x3b   : > { %2477 = vmatmul.mubr.msk.f32.vlgmr.msra.gmra.mxu0 %vm265_vm0, %v2829_v9  ;;  %2488 = vmatmul.mubr.msk.f32.vlgmr.msra.gmra.mxu1 %vm265_vm0, %v2829_v9 }
  0x3c   : > { %2490 = vmatprep.subr.mxu0 %v2713_v2  ;;  %2501 = vmatprep.subr.mxu1 %v2713_v2 }
  0x3d   : > { %2498 = vmatprep.mubr.msk.f32.mxu0 %vm2714_vm1, %v2713_v2  ;;  %2509 = vmatprep.mubr.msk.f32.mxu1 %vm2714_vm1, %v2713_v2 }
  0x3e   : > { %2491 = vmatpush3.msra.mxu0 %v2272_v34  ;;  %2502 = vmatpush3.msra.mxu1 %v2276_v35 }
  0x3f   : > { %2492 = vmatprep.subr.mxu0 %v2713_v2  ;;  %2503 = vmatprep.subr.mxu1 %v2713_v2 }
  0x40   : > { %2493 = vmatpush3.msra.mxu0 %v2271_v36  ;;  %2504 = vmatpush3.msra.mxu1 %v2275_v37 }
  0x41   : > { %2494 = vmatprep.subr.mxu0 %v2713_v2  ;;  %2505 = vmatprep.subr.mxu1 %v2713_v2 }
  0x42   : > { %2495 = vmatpush3.msra.mxu0 %v2270_v38  ;;  %2506 = vmatpush3.msra.mxu1 %v2274_v39 }
  0x43   : > { %2496 = vmatprep.subr.mxu0 %v2713_v2  ;;  %2507 = vmatprep.subr.mxu1 %v2713_v2 }
  0x44   : > { %2497 = vmatpush3.msra.mxu0 %v2269_v40  ;;  %2508 = vmatpush3.msra.mxu1 %v2273_v41 }
  0x45   : > { %2512 = vmatprep.subr.mxu0 %v2713_v2  ;;  %2523 = vmatprep.subr.mxu1 %v2713_v2 }
  0x46   : > { %2499 = vmatmul.mubr.msk.f32.vlgmr.msra.gmra.mxu0 %vm265_vm0, %v2829_v9  ;;  %2510 = vmatmul.mubr.msk.f32.vlgmr.msra.gmra.mxu1 %vm265_vm0, %v2829_v9 }
  0x47   : > { %2513 = vmatpush3.msra.mxu0 %v2280_v42  ;;  %2524 = vmatpush3.msra.mxu1 %v2284_v43 }
  0x48   : > { %2514 = vmatprep.subr.mxu0 %v2713_v2  ;;  %2525 = vmatprep.subr.mxu1 %v2713_v2 }
  0x49   : > { %2515 = vmatpush3.msra.mxu0 %v2279_v44  ;;  %2526 = vmatpush3.msra.mxu1 %v2283_v45 }
  0x4a   : > { %2516 = vmatprep.subr.mxu0 %v2713_v2  ;;  %2527 = vmatprep.subr.mxu1 %v2713_v2 }
  0x4b   : > { %2517 = vmatpush3.msra.mxu0 %v2278_v46  ;;  %2528 = vmatpush3.msra.mxu1 %v2282_v47 }
  0x4c   : > { %2518 = vmatprep.subr.mxu0 %v2713_v2  ;;  %2529 = vmatprep.subr.mxu1 %v2713_v2 }
  0x4d   : > { %2520 = vmatprep.mubr.msk.f32.mxu0 %vm2714_vm1, %v2713_v2  ;;  %2531 = vmatprep.mubr.msk.f32.mxu1 %vm2714_vm1, %v2713_v2 }
  0x4e   : > { %2519 = vmatpush3.msra.mxu0 %v2277_v48  ;;  %2530 = vmatpush3.msra.mxu1 %v2281_v49 }
  0x4f   : > { %2521 = vmatmul.mubr.msk.f32.vlgmr.msra.gmra.mxu0 %vm265_vm0, %v2829_v9  ;;  %2532 = vmatmul.mubr.msk.f32.vlgmr.msra.gmra.mxu1 %vm265_vm0, %v2829_v9 }
  0x50   : > { %2534 = vmatprep.subr.mxu0 %v2713_v2  ;;  %2539 = vmatprep.subr.mxu1 %v2713_v2 }
  0x51   : > { %2536 = vmatprep.mubr.msk.f32.mxu0 %vm2714_vm1, %v2713_v2  ;;  %2541 = vmatprep.mubr.msk.f32.mxu1 %vm2714_vm1, %v2713_v2 }
  0xdc   : > { %v335_v50 = vpop.f32.mrf.mxu0 }
  0xdd   : > { %v336_v5 = vadd.f32 %v2233_v62, %v335_v50 }
  0xde   : > { %v2412_v51 = vpop.f32.mrf.mxu0  ;;  %v405_v52 = vpop.f32.mrf.mxu1 }
  0xdf   : > { %v406_v6 = vadd.f32 %v2234_v63, %v405_v52 }
  0xe0   : > { %v2423_v53 = vpop.f32.mrf.mxu1 }
  0xe6   : > { %v475_v54 = vpop.f32.mrf.mxu0 }
  0xe7   : > { %v476_v17 = vadd.f32 %v2235_v11, %v475_v54 }
  0xe8   : > { %v2434_v55 = vpop.f32.mrf.mxu0  ;;  %v545_v56 = vpop.f32.mrf.mxu1 }
  0xe9   : > { %v546_v18 = vadd.f32 %v2236_v12, %v545_v56 }
  0xea   : > { %v2445_v57 = vpop.f32.mrf.mxu1 }
  0xf1   : > { %v661_v60 = vpop.f32.mrf.mxu0  ;;  %v731_v61 = vpop.f32.mrf.mxu1 }
  0xf2   : > { %v662_v0 = vadd.f32 %v2261_v58, %v661_v60  ;;  %v732_v1 = vadd.f32 %v2262_v59, %v731_v61 }
  0xf3   : > { %v2456_v3 = vpop.f32.mrf.mxu0  ;;  %v2467_v4 = vpop.f32.mrf.mxu1 }
  0xf4   : > { %2535 = vmatpush3.xpose.msk.msra.mxu0 %vm1201_vm2, %v662_v0  ;;  %2540 = vmatpush3.xpose.msk.msra.mxu1 %vm1201_vm2, %v732_v1  ;;  %v2291_v3 = vld [vmem:[%s3196_s2 + $0xa] ss:$0 sm:$0xff] }
  0xf5   : > { %2544 = vmatprep.subr.mxu0 %v2713_v2  ;;  %2549 = vmatprep.subr.mxu1 %v2713_v2 }
  0xf7   : > { %2537 = vmatmul.mubr.msk.f32.vlgmr.msra.gmra.mxu0 %vm1201_vm2, %v336_v5  ;;  %2542 = vmatmul.mubr.msk.f32.vlgmr.msra.gmra.mxu1 %vm1201_vm2, %v406_v6 }
  0xf8   : > { %2546 = vmatprep.mubr.msk.f32.mxu0 %vm2714_vm1, %v2713_v2  ;;  %2551 = vmatprep.mubr.msk.f32.mxu1 %vm2714_vm1, %v2713_v2 }
  0xfb   : > { %v801_v9 = vpop.f32.mrf.mxu0  ;;  %v871_v10 = vpop.f32.mrf.mxu1 }
  0xfc   : > { %v802_v13 = vadd.f32 %v2263_v7, %v801_v9  ;;  %v872_v14 = vadd.f32 %v2264_v8, %v871_v10  ;;  %v2292_v8 = vld [vmem:[%s3196_s2 + $0xb] ss:$0 sm:$0xff] }
  0xfd   : > { %v2478_v15 = vpop.f32.mrf.mxu0  ;;  %v2489_v16 = vpop.f32.mrf.mxu1 }
  0xfe   : > { %2545 = vmatpush3.xpose.msk.msra.mxu0 %vm1201_vm2, %v802_v13  ;;  %2550 = vmatpush3.xpose.msk.msra.mxu1 %vm1201_vm2, %v872_v14  ;;  %v1842_v16 = vld [vmem:[%s3197_s3] sm:$0xff] }
  0xff   : > { %2554 = vmatprep.subr.mxu0 %v2713_v2  ;;  %2559 = vmatprep.subr.mxu1 %v2713_v2 }
 0x101   : > { %2547 = vmatmul.mubr.msk.f32.vlgmr.msra.gmra.mxu0 %vm1201_vm2, %v476_v17  ;;  %2552 = vmatmul.mubr.msk.f32.vlgmr.msra.gmra.mxu1 %vm1201_vm2, %v546_v18  ;;  %v1843_v17 = vld [vmem:[%s3197_s3 + $0x8] sm:$0xff]  ;;  %v1844_v18 = vld [vmem:[%s3197_s3 + $0x10] sm:$0xff] }
 0x102   : > { %2556 = vmatprep.mubr.msk.f32.mxu0 %vm2714_vm1, %v2713_v2  ;;  %2561 = vmatprep.mubr.msk.f32.mxu1 %vm2714_vm1, %v2713_v2 }
 0x106   : > { %v987_v21 = vpop.f32.mrf.mxu0  ;;  %v1057_v22 = vpop.f32.mrf.mxu1 }
 0x107   : > { %v988_v23 = vadd.f32 %v2289_v19, %v987_v21  ;;  %v1058_v24 = vadd.f32 %v2290_v20, %v1057_v22  ;;  %v1845_v21 = vld [vmem:[%s3197_s3 + $0x18] sm:$0xff] }
 0x108   : > { %v2500_v25 = vpop.f32.mrf.mxu0  ;;  %v2511_v26 = vpop.f32.mrf.mxu1 }
 0x109   : > { %2555 = vmatpush3.msra.mxu0 %v988_v23  ;;  %2560 = vmatpush3.msra.mxu1 %v1058_v24 }
 0x10a   : > { %2564 = vmatprep.subr.mxu0 %v2713_v2  ;;  %2569 = vmatprep.subr.mxu1 %v2713_v2 }
 0x10f   : > { %v1127_v27 = vpop.f32.mrf.mxu0  ;;  %v3099_v28 = vpop.f32.mrf.mxu1 }
 0x110   : > { %v1128_v7 = vadd.f32 %v2291_v3, %v1127_v27  ;;  %v1198_v11 = vadd.f32 %v2292_v8, %v3099_v28 }
 0x111   : > { %v2522_v29 = vpop.f32.mrf.mxu0  ;;  %v2533_v30 = vpop.f32.mrf.mxu1 }
 0x1b7   : > { %v1274_v31 = vpop.f32.mrf.mxu0  ;;  %v1350_v32 = vpop.f32.mrf.mxu1 }
 0x1b8   : > { %v1506_v33 = vsel %vm1201_vm2, %v1274_v31, -inf  ;;  %v1509_v36 = vsel %vm1201_vm2, %v1350_v32, -inf }
 0x1b9   : > { %v2543_v34 = vpop.f32.mrf.mxu1  ;;  %1507 = vmax.xlane.f32.xlu0 %v1506_v33  ;;  %v2538_v35 = vpop.f32.mrf.mxu0 }
 0x1bd   : > { %1510 = vmax.xlane.f32.xlu0 %v1509_v36 }
 0x1c1   : > { %v1426_v37 = vpop.f32.mrf.mxu0  ;;  %v1502_v38 = vpop.f32.mrf.mxu1 }
 0x1c2   : > { %v1512_v39 = vsel %vm1201_vm2, %v1426_v37, -inf  ;;  %v1515_v42 = vsel %vm1201_vm2, %v1502_v38, -inf }
 0x1c3   : > { %v2553_v40 = vpop.f32.mrf.mxu1  ;;  %1513 = vmax.xlane.f32.xlu1 %v1512_v39  ;;  %v2548_v41 = vpop.f32.mrf.mxu0 }
 0x1c4   : > { %v2313_v40 = vld [vmem:[%s3198_s4] ss:$0 sm:$0xff] }
 0x1c7   : > { %1516 = vmax.xlane.f32.xlu1 %v1515_v42 }
 0x242   : > { %v1508_v43 = vpop.xlane.xlu0 %1507 }
 0x243   : > { %v1518_v44 = vsub.f32 %v1274_v31, %v1508_v43 }
 0x245   : > { %v1522_v45 = vmul.f32 1.442695, %v1518_v44 }
 0x246   : > { %v1511_v46 = vpop.xlane.xlu0 %1510 }
 0x247   : > { %2635 = vpow2.f32 %v1522_v45  ;;  %v1519_v47 = vsub.f32 %v1350_v32, %v1511_v46 }
 0x249   : > { %v1524_v48 = vmul.f32 1.442695, %v1519_v47 }
 0x24b   : > { %2637 = vpow2.f32 %v1524_v48 }
 0x24c   : > { %v1514_v49 = vpop.xlane.xlu1 %1513 }
 0x24d   : > { %v1520_v50 = vsub.f32 %v1426_v37, %v1514_v49 }
 0x24f   : > { %v1526_v51 = vmul.f32 1.442695, %v1520_v50 }
 0x250   : > { %v1517_v52 = vpop.xlane.xlu1 %1516 }
 0x251   : > { %2639 = vpow2.f32 %v1526_v51  ;;  %v1521_v53 = vsub.f32 %v1502_v38, %v1517_v52 }
 0x253   : > { %v1528_v54 = vmul.f32 1.442695, %v1521_v53 }
 0x254   : > { %v2636_v55 = vpop.eup %2635 }
 0x255   : > { %2641 = vpow2.f32 %v1528_v54  ;;  %v1530_v56 = vsel %vm1201_vm2, %v2636_v55, 0.0 }
 0x256   : > { %1531 = vadd.xlane.f32.xlu0 %v1530_v56 }
 0x258   : > { %v2638_v57 = vpop.eup %2637 }
 0x259   : > { %v1533_v58 = vsel %vm1201_vm2, %v2638_v57, 0.0 }
 0x25a   : > { %1534 = vadd.xlane.f32.xlu1 %v1533_v58 }
 0x25e   : > { %v2640_v59 = vpop.eup %2639 }
 0x25f   : > { %v1536_v60 = vsel %vm1201_vm2, %v2640_v59, 0.0 }
 0x260   : > { %1537 = vadd.xlane.f32.xlu0 %v1536_v60 }
 0x262   : > { %v2642_v61 = vpop.eup %2641 }
 0x263   : > { %v1539_v62 = vsel %vm1201_vm2, %v2642_v61, 0.0 }
 0x264   : > { %1540 = vadd.xlane.f32.xlu1 %v1539_v62 }
 0x2df   : > { %v1532_v63 = vpop.xlane.xlu0 %1531 }
 0x2e0   : > { %2643 = vrcp.f32 %v1532_v63 }
 0x2e3   : > { %v1535_v0 = vpop.xlane.xlu1 %1534 }
 0x2e4   : > { %2645 = vrcp.f32 %v1535_v0 }
 0x2e9   : > { %v1538_v1 = vpop.xlane.xlu0 %1537 }
 0x2ea   : > { %2647 = vrcp.f32 %v1538_v1 }
 0x2ed   : > { %v2644_v4 = vpop.eup %2643  ;;  %v1541_v5 = vpop.xlane.xlu1 %1540 }
 0x2ee   : > { %2649 = vrcp.f32 %v1541_v5  ;;  %v1546_v6 = vmul.f32 %v2644_v4, %v2636_v55 }
 0x2f0   : > { %2557 = vmatmul.mubr.msk.f32.vlgmr.msra.gmra.mxu0 %vm1201_vm2, %v1546_v6 }
 0x2f1   : > { %v2646_v9 = vpop.eup %2645  ;;  %2565 = vmatpush3.msra.mxu0 %v1128_v7  ;;  %2566 = vmatprep.mubr.msk.f32.mxu0 %vm2714_vm1, %v2713_v2 }
 0x2f2   : > { %v1547_v10 = vmul.f32 %v2646_v9, %v2638_v57  ;;  %2574 = vmatprep.subr.mxu0 %v2713_v2 }
 0x2f4   : > { %2562 = vmatmul.mubr.msk.f32.vlgmr.msra.gmra.mxu1 %vm1201_vm2, %v1547_v10 }
 0x2f5   : > { %2570 = vmatpush3.msra.mxu1 %v1198_v11  ;;  %2571 = vmatprep.mubr.msk.f32.mxu1 %vm2714_vm1, %v2713_v2 }
 0x2f6   : > { %2579 = vmatprep.subr.mxu1 %v2713_v2 }
 0x2f7   : > { %v2648_v12 = vpop.eup %2647 }
 0x2f8   : > { %v1548_v13 = vmul.f32 %v2648_v12, %v2640_v59 }
 0x2fa   : > { %2567 = vmatmul.mubr.msk.f32.vlgmr.msra.gmra.mxu0 %vm1201_vm2, %v1548_v13 }
 0x2fb   : > { %v2650_v14 = vpop.eup %2649  ;;  %2576 = vmatprep.mubr.msk.f32.mxu0 %vm2714_vm1, %v2713_v2  ;;  %2575 = vmatpush3.msra.mxu0 %v1842_v16 }
 0x2fc   : > { %v1549_v15 = vmul.f32 %v2650_v14, %v2642_v61  ;;  %2584 = vmatprep.subr.mxu0 %v2713_v2 }
 0x2fe   : > { %2572 = vmatmul.mubr.msk.f32.vlgmr.msra.gmra.mxu1 %vm1201_vm2, %v1549_v15 }
 0x2ff   : > { %2581 = vmatprep.mubr.msk.f32.mxu1 %vm2714_vm1, %v2713_v2  ;;  %2580 = vmatpush3.msra.mxu1 %v1843_v17 }
 0x300   : > { %2589 = vmatprep.subr.mxu1 %v2713_v2 }
 0x3b0   : > { %v1619_v19 = vpop.f32.mrf.mxu0 }
 0x3b1   : > { %2577 = vmatmul.mubr.msk.f32.vlgmr.msra.gmra.mxu0 %vm1201_vm2, %v1619_v19 }
 0x3b2   : > { %v2558_v20 = vpop.f32.mrf.mxu0  ;;  %2585 = vmatpush3.msra.mxu0 %v1844_v18  ;;  %2586 = vmatprep.mubr.msk.f32.mxu0 %vm2714_vm1, %v2713_v2 }
 0x3b4   : > { %v1692_v22 = vpop.f32.mrf.mxu1 }
 0x3b5   : > { %2582 = vmatmul.mubr.msk.f32.vlgmr.msra.gmra.mxu1 %vm1201_vm2, %v1692_v22 }
 0x3b6   : > { %v2563_v23 = vpop.f32.mrf.mxu1  ;;  %2590 = vmatpush3.msra.mxu1 %v1845_v21  ;;  %2591 = vmatprep.mubr.msk.f32.mxu1 %vm2714_vm1, %v2713_v2 }
 0x3ba   : > { %v1765_v24 = vpop.f32.mrf.mxu0 }
 0x3bb   : > { %2587 = vmatmul.mubr.msk.f32.vlgmr.msra.gmra.mxu0 %vm1201_vm2, %v1765_v24 }
 0x3bc   : > { %v2568_v25 = vpop.f32.mrf.mxu0 }
 0x3be   : > { %v1838_v26 = vpop.f32.mrf.mxu1 }
 0x3bf   : > { %2592 = vmatmul.mubr.msk.f32.vlgmr.msra.gmra.mxu1 %vm1201_vm2, %v1838_v26 }
 0x3c0   : > { %v2573_v27 = vpop.f32.mrf.mxu1 }
 0x471   : > { %v1915_v28 = vpop.f32.mrf.mxu0 }
 0x472   : > { %v2138_v2 = vsel %vm265_vm0, %v1915_v28, 0.0 }
 0x473   : > { %v2578_v29 = vpop.f32.mrf.mxu0 }
 0x475   : > { %v1988_v30 = vpop.f32.mrf.mxu1 }
 0x476   : > { %v2139_v32 = vsel %vm265_vm0, %v1988_v30, 0.0 }
 0x477   : > { %v2583_v31 = vpop.f32.mrf.mxu1  ;;  %v2140_v35 = vadd.f32 %v2139_v32, %v2138_v2 }
 0x47b   : > { %v2061_v33 = vpop.f32.mrf.mxu0 }
 0x47c   : > { %v2141_v34 = vsel %vm265_vm0, %v2061_v33, 0.0 }
 0x47d   : > { %v2588_v36 = vpop.f32.mrf.mxu0  ;;  %v2142_v37 = vadd.f32 %v2141_v34, %v2140_v35 }
 0x47f   : > { %v2134_v38 = vpop.f32.mrf.mxu1 }
 0x480   : > { %v2143_v39 = vsel %vm265_vm0, %v2134_v38, 0.0 }
 0x481   : > { %v2144_v41 = vadd.f32 %v2143_v39, %v2142_v37  ;;  %v2593_v42 = vpop.f32.mrf.mxu1 }
 0x483   : > { %v2152_v43 = vadd.f32 %v2313_v40, %v2144_v41 }
 0x485   : > { %2153 = vst.msk [vmem:[%s215_s15] sm:$0xff] %vm265_vm0, %v2152_v43 }
 0x486   : > { %2664 = shalt.err (!%p2661_p3)
}
 0x487   : > { %s2665_s8 = scalar_lea.hbm %s2166_s25, 128  ;;  %s2669_s11 = scalar_lea.hbm %s3199_s5, 256 }
 0x488   : > { %p2666_p4 = scmp.ne.s32.totalorder %s2166_s25, %s2665_s8  ;;  %p2670_p9 = scmp.lt.s32.totalorder %s2166_s25, %s3199_s5 }
 0x489   : > { %p2671_p10 = scmp.lt.s32.totalorder %s2669_s11, %s2665_s8 }
 0x48a   : > { %p2667_p7 = pnand %p2666_p4, %p2784_p5 }
 0x48b   : > { %p2672_p11 = por %p2671_p10, %p2670_p9 }
 0x48c   : > { %p2668_p8 = pneg %p2667_p7 }
 0x48e   : > { %p2673_p12 = pnand %p2672_p11, %p2668_p8 }
 0x490   : > { %2676 = shalt.err (!%p2673_p12)
}
 0x491   : > { %2594 = dma.vmem_to_hbm [thread:$0]  (%p2784_p5), %s2169_s16, 128, %s2166_s25, %s2155_s26  }
 0x492 PF: > { %p2600_p13 = scmp.ge.s32.totalorder %s2711_s21, 2  ;;  %s2180_s14 = sand.u32 1, %s2699_s18  }
 0x493   : > { %s2181_s15 = scalar_lea.sflag [#allocation3], %s2180_s14 }
 0x494   : > { %p2597_p0 = pnand %p2600_p13, %p2788_p6 }
 0x496   : > { %p2598_p1 = pneg %p2597_p0 }
 0x498   : > { %2694 = dma.done.wait (%p2598_p1), %s2181_s15, 128  }
 0x499   : > { %2696 = vsyncadd (%p2598_p1), %s2181_s15, 4294967168  ;;  %p15_p2 = scmp.ge.s32.totalorder %s2771_s24, 4   ;;  %s3202_s18 = smov %s2703_s19 }
 0x49a   : > { %s3203_s19 = smov %s2707_s20  ;;  %s3204_s20 = smov %s2782_s27 }
 0x49b   : > { %s3205_s21 = smov %s2771_s24  ;;  %17 = sbr.rel (!%p15_p2) target bundleno = 3 (0x3), region = 79 }
 0x4a0   :  { %2186 = vsyncpa [#allocation3], 1 }
 0x4a1   :  { %2188 = vsyncpa [#allocation3 + $0x1], 1 }

</bundles_post_ra>
